<compile_context>
chip_gen: v7x
topology: tpu7x:2x2x1
jax: 0.10.0
libtpu: 0.0.40
codegen_flags: <defaults>
</compile_context>

<pallas_src>
import jax
import jax.numpy as jnp
from jax import lax
from jax.experimental import pallas as pl
from jax.experimental.pallas import tpu as pltpu


def _round_up(x, m):
    return ((x + m - 1) // m) * m


def _mlp(x, params, tanh_out):
    h = x
    last = len(params) - 1
    for i, (w, b) in enumerate(params):
        h = h @ w + b
        if i < last:
            h = jnp.maximum(h, 0.0)
    return jnp.tanh(h) if tanh_out else h


def _make_kernel(D, B_pad, t_tile, CH, T, n_split, ntps, need_mask):
    n_chunks = t_tile // CH

    def kernel(ids_ref, mu_ref, divtab_ref, dmtab_ref, out_ref):
        be = pl.program_id(0)
        t = pl.program_id(1)

        @pl.when(t == 0)
        def _():
            out_ref[...] = jnp.zeros_like(out_ref)

        div_tab = divtab_ref[0]          # (D, B_pad) : iv[g] - iv[b]
        dm_tab = dmtab_ref[0]            # (D, B_pad) : 2*(mu*iv)[g] - 2*(mu*iv)[b]

        if n_split > 1:
            s = be % n_split
        else:
            s = 0
        tile_start = (s * ntps + t) * t_tile     # logical (unclamped) time offset

        acc = jnp.zeros((D, CH), jnp.float32)
        for ci in range(n_chunks):
            yc = mu_ref[0, :, ci * CH:(ci + 1) * CH].astype(jnp.float32)   # (D, CH)
            if need_mask:
                lane = lax.broadcasted_iota(jnp.int32, (1, CH), 1)
                valid = (tile_start + ci * CH + lane) < T
                yc = jnp.where(valid, yc, 0.0)
            ids = ids_ref[0, :, ci * CH:(ci + 1) * CH]                      # (1, CH) i32
            onehot = (lax.broadcasted_iota(jnp.int32, (B_pad, CH), 0)
                      == ids).astype(jnp.float32)                           # (B_pad, CH)
            sel_div = jnp.dot(div_tab, onehot, preferred_element_type=jnp.float32)
            sel_dm = jnp.dot(dm_tab, onehot, preferred_element_type=jnp.float32)
            acc = acc + yc * (sel_div * yc - sel_dm)
        out_ref[...] += acc[None]

    return kernel


def club_mi_est(emb, mu, params_mu, params_logvar, perm_key, *,
                max_t_tile=2048, max_stream_vmem_bytes=8 * 1024 * 1024):
    """Pallas implementation of CLUBSample_group.mi_est(emb, mu.transpose(1, 2))."""
    B, D, T = mu.shape
    assert emb.shape == (B, D)
    N = B * T

    # --- tiny per-batch head: the two 4-layer MLPs (hoisted out of the kernel). ---
    p32 = lambda ps: [(w.astype(jnp.float32), b.astype(jnp.float32)) for w, b in ps]
    emb32 = emb.astype(jnp.float32)
    mu_hat = _mlp(emb32, p32(params_mu), False)          # (B, D)
    logvar = _mlp(emb32, p32(params_logvar), True)       # (B, D)
    iv = jnp.exp(-logvar)
    miv = mu_hat * iv

    # --- permutation bookkeeping: O(N) int32 work, the (N,D) tensor is untouched. ---
    perm = jax.random.permutation(perm_key, N)           # torch.randperm equivalent
    inv_perm = jnp.argsort(perm)                         # perm^-1
    cross = (inv_perm // T).astype(jnp.int32).reshape(B, T)   # source batch per position

    # --- tiling (no divisor requirement -> no perf cliff for awkward T). ---
    itemsize = jnp.dtype(mu.dtype).itemsize
    if T >= 128:
        t_tile = min(_round_up(max_t_tile, 128), (T // 128) * 128)
        cap = max(128, (max_stream_vmem_bytes // (2 * D * itemsize)) // 128 * 128)
        t_tile = max(128, min(t_tile, cap))
    else:
        t_tile = T                                       # full-axis block (< 128 lanes)
    n_t = -(-T // t_tile)
    CH = min(128, t_tile)

    # v7x has 2 TensorCores: make sure the "parallel" axis has extent >= 2 for odd B.
    n_split = 2 if (B % 2 == 1 and n_t >= 2) else 1
    ntps = -(-n_t // n_split)
    need_mask = (n_split * ntps * t_tile != T)

    # --- per-batch difference tables (tiny) and padded per-position source-batch ids. ---
    B_pad = max(8, _round_up(B, 8))
    iv_pad = jnp.pad(iv, ((0, B_pad - B), (0, 0)))
    miv_pad = jnp.pad(miv, ((0, B_pad - B), (0, 0)))
    divtab = iv_pad.T[None, :, :] - iv[:, :, None]              # (B, D, B_pad)
    dmtab = 2.0 * (miv_pad.T[None, :, :] - miv[:, :, None])     # (B, D, B_pad)

    L = n_split * ntps * t_tile
    ids = jnp.zeros((B, 1, L), jnp.int32).at[:, 0, :T].set(cross)

    def ids_map(be, t):
        if n_split > 1:
            return (be // n_split, 0, (be % n_split) * ntps + t)
        return (be, 0, t)

    def stream_map(be, t):
        if n_split > 1:
            tt = (be % n_split) * ntps + t
            return (be // n_split, 0, jnp.minimum(tt, n_t - 1))
        return (be, 0, jnp.minimum(t, n_t - 1))

    def table_map(be, t):
        if n_split > 1:
            return (be // n_split, 0, 0)
        return (be, 0, 0)

    kernel = _make_kernel(D, B_pad, t_tile, CH, T, n_split, ntps, need_mask)

    raw = pl.pallas_call(
        kernel,
        out_shape=jax.ShapeDtypeStruct((B * n_split, D, CH), jnp.float32),
        grid=(B * n_split, ntps),
        in_specs=[
            pl.BlockSpec((1, 1, t_tile), ids_map),        # per-position source-batch id
            pl.BlockSpec((1, D, t_tile), stream_map),     # mu streamed in native layout
            pl.BlockSpec((1, D, B_pad), table_map),       # iv difference table
            pl.BlockSpec((1, D, B_pad), table_map),       # 2*mu*iv difference table
        ],
        out_specs=pl.BlockSpec((1, D, CH), lambda be, t: (be, 0, 0)),
        compiler_params=pltpu.CompilerParams(
            dimension_semantics=("parallel", "arbitrary"),
            vmem_limit_bytes=32 * 1024 * 1024),
    )(ids, mu, divtab, dmtab)

    # (pos.sum(-1) - neg.sum(-1)).mean() / 2 ; the mu^2*iv constant cancels exactly.
    return jnp.sum(raw) / (2.0 * N)


def mi_forward(mu, emb, params_mu, params_logvar, perm_key, **kw):
    """MI.forward(mu, emb, train=False) -> mi_club.mi_est(emb, mu.transpose(1,2))."""
    return club_mi_est(emb, mu, params_mu, params_logvar, perm_key, **kw)


# ---------------------------- reference & test harness ----------------------------

def init_linear(key, fan_in, fan_out):
    kw, kb = jax.random.split(key)
    bound = 1.0 / jnp.sqrt(fan_in)
    w = jax.random.uniform(kw, (fan_in, fan_out), jnp.float32, -bound, bound)
    b = jax.random.uniform(kb, (1, fan_out), jnp.float32, -bound, bound)
    return w, b


def init_club_mlp(key, x_dim, y_dim, hidden):
    h = hidden // 2
    dims = [(x_dim, h), (h, h), (h, h), (h, y_dim)]
    keys = jax.random.split(key, len(dims))
    return [init_linear(k, fi, fo) for k, (fi, fo) in zip(keys, dims)]


def reference_mi_est(emb, mu, params_mu, params_logvar, perm_key):
    """Pure-JAX transcription of CLUBSample_group.mi_est for validation."""
    B, D, T = mu.shape
    N = B * T
    y = jnp.transpose(mu, (0, 2, 1)).reshape(N, D).astype(jnp.float32)
    x = jnp.broadcast_to(emb.astype(jnp.float32)[:, None, :], (B, T, D)).reshape(N, D)
    perm = jax.random.permutation(perm_key, N)
    mu_hat = _mlp(x, params_mu, False)
    logvar = _mlp(x, params_logvar, True)
    inv_var = jnp.exp(-logvar)
    pos = -(mu_hat - y) ** 2 * inv_var
    neg = -(mu_hat - y[perm]) ** 2 * inv_var
    return (pos.sum(-1) - neg.sum(-1)).mean() / 2.0


if __name__ == "__main__":
    root = jax.random.PRNGKey(0)
    k_pmu, k_plv = jax.random.split(root, 2)

    D = 32                                   # cfg['club']['hidden_size'] = 32
    params_mu = init_club_mlp(k_pmu, D, D, D)
    params_logvar = init_club_mlp(k_plv, D, D, D)

    # (B, T, max_t_tile, dtype): covers multi-chunk + ragged-tail masking, the exact
    # (unmasked) tiling path with bf16 streaming, and the odd-B T-split (v7x 2-TC) path.
    configs = [
        (2, 320, 2048, jnp.float32),
        (3, 300, 128, jnp.float32),
        (2, 256, 128, jnp.bfloat16),
    ]
    for i, (B, T, mtt, dt) in enumerate(configs):
        kd = jax.random.fold_in(root, i)
        k_mu, k_emb, k_perm = jax.random.split(kd, 3)
        mu_in = jax.random.normal(k_mu, (B, D, T), jnp.float32).astype(dt)
        emb_in = jax.random.normal(k_emb, (B, D), jnp.float32)

        out = mi_forward(mu_in, emb_in, params_mu, params_logvar, k_perm, max_t_tile=mtt)
        out = jax.block_until_ready(out)

        ref = reference_mi_est(emb_in, mu_in.astype(jnp.float32),
                               params_mu, params_logvar, k_perm)
        assert jnp.allclose(out, ref, rtol=1e-3, atol=1e-3), (i, out, ref)

    print("KERNEL_OK")
</pallas_src>

<mosaic_0001>
module attributes {stable_mosaic.version = 11 : i64} {
  func.func @kernel(%arg0: i32, %arg1: i32, %arg2: memref<1x1x256xi32, #tpu.memory_space<vmem>>, %arg3: memref<1x32x256xf32, #tpu.memory_space<vmem>>, %arg4: memref<1x32x8xf32, #tpu.memory_space<vmem>>, %arg5: memref<1x32x8xf32, #tpu.memory_space<vmem>>, %arg6: memref<1x32x128xf32, #tpu.memory_space<vmem>>) attributes {dimension_semantics = [#tpu.dimension_semantics<parallel>, #tpu.dimension_semantics<arbitrary>], iteration_bounds = array<i64: 2, 2>, scalar_prefetch = 0 : i64, scratch_operands = 0 : i64, tpu.core_type = #tpu.core_type<tc>, window_params = [{transform_indices = @transform_0, window_bounds = array<i64: 1, 1, 256>}, {transform_indices = @transform_1, window_bounds = array<i64: 1, 32, 256>}, {transform_indices = @transform_2, window_bounds = array<i64: 1, 32, 8>}, {transform_indices = @transform_3, window_bounds = array<i64: 1, 32, 8>}, {transform_indices = @transform_4, window_bounds = array<i64: 1, 32, 128>}]} {
    %c0_i32 = arith.constant 0 : i32
    %0 = arith.cmpi eq, %arg1, %c0_i32 : i32
    %1 = arith.extui %0 : i1 to i32
    %c0_i32_0 = arith.constant 0 : i32
    %2 = arith.cmpi ne, %1, %c0_i32_0 : i32
    scf.if %2 {
      %cst_32 = arith.constant 0.000000e+00 : f32
      %64 = vector.broadcast %cst_32 : f32 to vector<1x32x128xf32>
      %c0_33 = arith.constant 0 : index
      %c0_34 = arith.constant 0 : index
      %c0_35 = arith.constant 0 : index
      %65 = vector.load %arg6[%c0_33, %c0_34, %c0_35] : memref<1x32x128xf32, #tpu.memory_space<vmem>>, vector<1x32x128xf32>
      tpu.vector_store %arg6[%c0_33, %c0_34, %c0_35], %64 {strides = array<i32>} : memref<1x32x128xf32, #tpu.memory_space<vmem>>, vector<1x32x128xf32>,
    } else {
    }
    %c0 = arith.constant 0 : index
    %c0_1 = arith.constant 0 : index
    %c0_2 = arith.constant 0 : index
    %3 = vector.load %arg4[%c0, %c0_1, %c0_2] : memref<1x32x8xf32, #tpu.memory_space<vmem>>, vector<1x32x8xf32>
    %4 = vector.shape_cast %3 : vector<1x32x8xf32> to vector<32x8xf32>
    %c0_3 = arith.constant 0 : index
    %c0_4 = arith.constant 0 : index
    %c0_5 = arith.constant 0 : index
    %5 = vector.load %arg5[%c0_3, %c0_4, %c0_5] : memref<1x32x8xf32, #tpu.memory_space<vmem>>, vector<1x32x8xf32>
    %6 = vector.shape_cast %5 : vector<1x32x8xf32> to vector<32x8xf32>
    %c0_i32_6 = arith.constant 0 : i32
    %7 = arith.addi %c0_i32_6, %arg1 : i32
    %c256_i32 = arith.constant 256 : i32
    %8 = arith.muli %7, %c256_i32 : i32
    %cst = arith.constant 0.000000e+00 : f32
    %9 = vector.broadcast %cst : f32 to vector<32x128xf32>
    %c0_7 = arith.constant 0 : index
    %c0_8 = arith.constant 0 : index
    %c0_9 = arith.constant 0 : index
    %10 = vector.load %arg3[%c0_7, %c0_8, %c0_9] : memref<1x32x256xf32, #tpu.memory_space<vmem>>, vector<1x32x128xf32>
    %11 = vector.shape_cast %10 : vector<1x32x128xf32> to vector<32x128xf32>
    %12 = tpu.iota {dimensions = array<i32: 1>} : vector<1x128xi32>
    %c0_i32_10 = arith.constant 0 : i32
    %13 = arith.addi %8, %c0_i32_10 : i32
    %14 = vector.broadcast %13 : i32 to vector<1x128xi32>
    %15 = arith.addi %14, %12 : vector<1x128xi32>
    %c320_i32 = arith.constant 320 : i32
    %16 = vector.broadcast %c320_i32 : i32 to vector<1x128xi32>
    %17 = arith.cmpi slt, %15, %16 : vector<1x128xi32>
    %cst_11 = arith.constant 0.000000e+00 : f32
    %18 = vector.shape_cast %17 : vector<1x128xi1> to vector<1x128xi1>
    %19 = vector.broadcast %18 : vector<1x128xi1> to vector<32x128xi1>
    %20 = vector.broadcast %cst_11 : f32 to vector<32x128xf32>
    %21 = arith.select %19, %11, %20 : vector<32x128xi1>, vector<32x128xf32>
    %c0_12 = arith.constant 0 : index
    %c0_13 = arith.constant 0 : index
    %c0_14 = arith.constant 0 : index
    %22 = vector.load %arg2[%c0_12, %c0_13, %c0_14] : memref<1x1x256xi32, #tpu.memory_space<vmem>>, vector<1x1x128xi32>
    %23 = vector.shape_cast %22 : vector<1x1x128xi32> to vector<1x128xi32>
    %24 = tpu.iota {dimensions = array<i32: 0>} : vector<8x128xi32>
    %25 = vector.broadcast %23 : vector<1x128xi32> to vector<8x128xi32>
    %26 = arith.cmpi eq, %24, %25 : vector<8x128xi32>
    %27 = arith.extui %26 : vector<8x128xi1> to vector<8x128xi32>
    %28 = arith.sitofp %27 : vector<8x128xi32> to vector<8x128xf32>
    %cst_15 = arith.constant dense<0.000000e+00> : vector<32x128xf32>
    %29 = tpu.matmul %4, %28, %cst_15 {dimension_numbers = #tpu.dot_dimension_numbers<[1], [0], [0], [1], [0, 0, 1, 1], [], []>} : vector<32x8xf32>, vector<8x128xf32>, vector<32x128xf32> -> vector<32x128xf32>
    %cst_16 = arith.constant dense<0.000000e+00> : vector<32x128xf32>
    %30 = tpu.matmul %6, %28, %cst_16 {dimension_numbers = #tpu.dot_dimension_numbers<[1], [0], [0], [1], [0, 0, 1, 1], [], []>} : vector<32x8xf32>, vector<8x128xf32>, vector<32x128xf32> -> vector<32x128xf32>
    %31 = arith.mulf %29, %21 : vector<32x128xf32>
    %32 = arith.subf %31, %30 : vector<32x128xf32>
    %33 = arith.mulf %21, %32 : vector<32x128xf32>
    %34 = arith.addf %9, %33 : vector<32x128xf32>
    %c0_17 = arith.constant 0 : index
    %c0_18 = arith.constant 0 : index
    %c128 = arith.constant 128 : index
    %35 = vector.load %arg3[%c0_17, %c0_18, %c128] : memref<1x32x256xf32, #tpu.memory_space<vmem>>, vector<1x32x128xf32>
    %36 = vector.shape_cast %35 : vector<1x32x128xf32> to vector<32x128xf32>
    %37 = tpu.iota {dimensions = array<i32: 1>} : vector<1x128xi32>
    %c128_i32 = arith.constant 128 : i32
    %38 = arith.addi %8, %c128_i32 : i32
    %39 = vector.broadcast %38 : i32 to vector<1x128xi32>
    %40 = arith.addi %39, %37 : vector<1x128xi32>
    %c320_i32_19 = arith.constant 320 : i32
    %41 = vector.broadcast %c320_i32_19 : i32 to vector<1x128xi32>
    %42 = arith.cmpi slt, %40, %41 : vector<1x128xi32>
    %cst_20 = arith.constant 0.000000e+00 : f32
    %43 = vector.shape_cast %42 : vector<1x128xi1> to vector<1x128xi1>
    %44 = vector.broadcast %43 : vector<1x128xi1> to vector<32x128xi1>
    %45 = vector.broadcast %cst_20 : f32 to vector<32x128xf32>
    %46 = arith.select %44, %36, %45 : vector<32x128xi1>, vector<32x128xf32>
    %c0_21 = arith.constant 0 : index
    %c0_22 = arith.constant 0 : index
    %c128_23 = arith.constant 128 : index
    %47 = vector.load %arg2[%c0_21, %c0_22, %c128_23] : memref<1x1x256xi32, #tpu.memory_space<vmem>>, vector<1x1x128xi32>
    %48 = vector.shape_cast %47 : vector<1x1x128xi32> to vector<1x128xi32>
    %49 = tpu.iota {dimensions = array<i32: 0>} : vector<8x128xi32>
    %50 = vector.broadcast %48 : vector<1x128xi32> to vector<8x128xi32>
    %51 = arith.cmpi eq, %49, %50 : vector<8x128xi32>
    %52 = arith.extui %51 : vector<8x128xi1> to vector<8x128xi32>
    %53 = arith.sitofp %52 : vector<8x128xi32> to vector<8x128xf32>
    %cst_24 = arith.constant dense<0.000000e+00> : vector<32x128xf32>
    %54 = tpu.matmul %4, %53, %cst_24 {dimension_numbers = #tpu.dot_dimension_numbers<[1], [0], [0], [1], [0, 0, 1, 1], [], []>} : vector<32x8xf32>, vector<8x128xf32>, vector<32x128xf32> -> vector<32x128xf32>
    %cst_25 = arith.constant dense<0.000000e+00> : vector<32x128xf32>
    %55 = tpu.matmul %6, %53, %cst_25 {dimension_numbers = #tpu.dot_dimension_numbers<[1], [0], [0], [1], [0, 0, 1, 1], [], []>} : vector<32x8xf32>, vector<8x128xf32>, vector<32x128xf32> -> vector<32x128xf32>
    %56 = arith.mulf %54, %46 : vector<32x128xf32>
    %57 = arith.subf %56, %55 : vector<32x128xf32>
    %58 = arith.mulf %46, %57 : vector<32x128xf32>
    %59 = arith.addf %34, %58 : vector<32x128xf32>
    %c0_26 = arith.constant 0 : index
    %c0_27 = arith.constant 0 : index
    %c0_28 = arith.constant 0 : index
    %60 = vector.load %arg6[%c0_26, %c0_27, %c0_28] : memref<1x32x128xf32, #tpu.memory_space<vmem>>, vector<1x32x128xf32>
    %61 = vector.shape_cast %59 : vector<32x128xf32> to vector<1x32x128xf32>
    %62 = arith.addf %60, %61 : vector<1x32x128xf32>
    %c0_29 = arith.constant 0 : index
    %c0_30 = arith.constant 0 : index
    %c0_31 = arith.constant 0 : index
    %63 = vector.load %arg6[%c0_29, %c0_30, %c0_31] : memref<1x32x128xf32, #tpu.memory_space<vmem>>, vector<1x32x128xf32>
    tpu.vector_store %arg6[%c0_29, %c0_30, %c0_31], %62 {strides = array<i32>} : memref<1x32x128xf32, #tpu.memory_space<vmem>>, vector<1x32x128xf32>,
    return
  }
  func.func @transform_0(%arg0: i32, %arg1: i32) -> (i32, i32, i32) {
    %c0_i32 = arith.constant 0 : i32
    %c0_i32_0 = arith.constant 0 : i32
    return %arg0, %c0_i32, %arg1 : i32, i32, i32
  }
  func.func @transform_1(%arg0: i32, %arg1: i32) -> (i32, i32, i32) {
    %c1_i32 = arith.constant 1 : i32
    %0 = arith.minsi %arg1, %c1_i32 : i32
    %c0_i32 = arith.constant 0 : i32
    %c0_i32_0 = arith.constant 0 : i32
    return %arg0, %c0_i32, %0 : i32, i32, i32
  }
  func.func @transform_2(%arg0: i32, %arg1: i32) -> (i32, i32, i32) {
    %c0_i32 = arith.constant 0 : i32
    %c0_i32_0 = arith.constant 0 : i32
    %c0_i32_1 = arith.constant 0 : i32
    return %arg0, %c0_i32, %c0_i32_0 : i32, i32, i32
  }
  func.func @transform_3(%arg0: i32, %arg1: i32) -> (i32, i32, i32) {
    %c0_i32 = arith.constant 0 : i32
    %c0_i32_0 = arith.constant 0 : i32
    %c0_i32_1 = arith.constant 0 : i32
    return %arg0, %c0_i32, %c0_i32_0 : i32, i32, i32
  }
  func.func @transform_4(%arg0: i32, %arg1: i32) -> (i32, i32, i32) {
    %c0_i32 = arith.constant 0 : i32
    %c0_i32_0 = arith.constant 0 : i32
    %c0_i32_1 = arith.constant 0 : i32
    return %arg0, %c0_i32, %c0_i32_0 : i32, i32, i32
  }
}

</mosaic_0001>

<bundles_post_ra>
// kernel: tpu_custom_call.1
= control target key start
LH: loop header
LB: loop body
LE: loop exit
PB: predicated region body
PF: predicated region fallthrough
CT: control target
= control target key end

     0   :  { %s1658_s0 = inlined_call_operand.vmem [shape: s32[2,1,512], index: 0, kind: input, shape index: {}]   ;;  %s1659_s1 = inlined_call_operand.hbm [shape: f32[2,32,320], index: 1, kind: input, shape index: {}]   ;;  %s1660_s2 = inlined_call_operand.vmem [shape: f32[2,32,8], index: 2, kind: input, shape index: {}]   ;;  %s1661_s3 = inlined_call_operand.vmem [shape: f32[2,32,8], index: 3, kind: input, shape index: {}]   ;;  %s1662_s4 = inlined_call_operand.hbm [shape: f32[2,32,128], index: 4, kind: output, shape index: {}]  }
   0x1   :  { %1668 = sst [smem:[#allocation14_spill]] %s1659_s1 }
   0x2   :  { %9 = vsyncpa [#allocation3], 0 }
   0x3   :  { %11 = vsyncpa [#allocation3 + $0x1], 0 }
   0x4   :  { %12 = vsyncpa [#allocation4], 0 }
   0x5   :  { %14 = vsyncpa [#allocation4 + $0x1], 0  ;;  %s1335_s15 = smov 0   ;;  %s1337_s16 = smov 0  }
   0x6   :  { %s1339_s17 = smov 0   ;;  %s1341_s18 = smov 0  }
   0x7   :  { %s1343_s19 = smov 0   ;;  %s1345_s20 = smov 0  }
   0x8   :  { %s1347_s21 = smov 0   ;;  %s1349_s22 = smov 0  }
   0x9   :  { %s1351_s23 = smov 0   ;;  %s1353_s24 = smov 0  }
   0xa   :  { %s1355_s25 = smov 0  }
   0xb LB: > { %1669 = sst [smem:[#allocation8_spill]] %s1280_s20  ;;  %s938_s26 = sadd.s32 4294967295, %s1300_s25   ;;  %s1300_s25 = sphi %s1355_s25, %s20_s25   ;;  %s1296_s24 = sphi %s1353_s24, %s1694_s24   ;;  %s1292_s23 = sphi %s1351_s23, %s1686_s23   ;;  %s1288_s22 = sphi %s1349_s22, %s1693_s22   ;;  %s1284_s21 = sphi %s1347_s21, %s1685_s21   ;;  %s1280_s20 = sphi %s1345_s20, %s1684_s20   ;;  %s1276_s19 = sphi %s1343_s19, %s1692_s19   ;;  %s1272_s18 = sphi %s1341_s18, %s1691_s18   ;;  %s1268_s17 = sphi %s1339_s17, %s1690_s17   ;;  %s1264_s16 = sphi %s1337_s16, %s1689_s16   ;;  %s1260_s15 = sphi %s1335_s15, %s1688_s15  }
   0xc   : > { %1670 = sst [smem:[#allocation9_spill]] %s1292_s23  ;;  %s939_s27 = sadd.s32 4294967294, %s1300_s25  }
   0xd   : > { %s29_s28 = sadd.s32 1, %s1292_s23  ;;  %s32_s29 = sadd.s32 1, %s1296_s24 }
   0xe   : > { %p30_p0 = scmp.ge.s32.totalorder %s29_s28, 2  ;;  %p64_p1 = scmp.lt.s32.totalorder %s1292_s23, 1 }
   0xf   : > { %s73_s30 = sadd.s32 1, %s1280_s20  ;;  %p80_p2 = scmp.ne.s32.totalorder %s1280_s20, %s1276_s19 }
  0x10   : > { %s1696_s28 = smov (%p30_p0, %s29_s28), 0  ;;  %s1698_s29 = smov (!%p30_p0, %s32_s29), %s1296_s24 }
  0x11   : > { %1671 = sst [smem:[#allocation10_spill]] %s1696_s28  ;;  %p34_p3 = scmp.ge.s32.totalorder %s1698_s29, 2 }
  0x12   : > { %s1402_s5 = scalar_select %p64_p1, %s1292_s23, 1 }
  0x13   : > { %p66_p4 = scmp.lt.s32.totalorder %s1696_s28, 1  ;;  %p81_p5 = scmp.eq.s32.totalorder %s1300_s25, 0 }
  0x14   : > { %p86_p6 = scmp.ne.s32.totalorder %s1276_s19, %s1272_s18  ;;  %s1700_s29 = smov (%p34_p3, %s1698_s29), 0 }
  0x15   : > { %1672 = sst [smem:[#allocation11_spill]] %s1700_s29  ;;  %s68_s7 = ssub.s32 %s1296_s24, %s1700_s29 }
  0x16   : > { %s67_s6 = scalar_select %p66_p4, %s1696_s28, 1 }
  0x17   : > { %p1413_p7 = por %p81_p5, %p80_p2  ;;  %p87_p8 = scmp.eq.s32.totalorder %s938_s26, 0 }
  0x18   : > { %s69_s9 = ssub.s32 %s1402_s5, %s67_s6  ;;  %p149_p9 = scmp.eq.s32.totalorder %s68_s7, 0 }
  0x19   : > { %s70_s10 = sor.u32 %s69_s9, %s68_s7  ;;  %p1420_p11 = por %p87_p8, %p86_p6 }
  0x1a   : > { %p71_p10 = scmp.eq.s32.totalorder %s70_s10, 0  ;;  %s151_s12 = sadd.s32 1, %s1268_s17 }
  0x1b   : > { %p161_p12 = scmp.ne.s32.totalorder %s1268_s17, %s1264_s16  ;;  %p162_p13 = scmp.eq.s32.totalorder %s938_s26, 3 }
  0x1c   : > { %s1428_s13 = scalar_select %p71_p10, %s1280_s20, %s73_s30  }
  0x1d   : > { %s1431_s14 = scalar_select %p149_p9, %s1268_s17, %s151_s12  }
  0x1e   : > { %1675 = sst [smem:[#allocation12_spill]] %s1428_s13  ;;  %p167_p0 = scmp.ne.s32.totalorder %s1264_s16, %s1260_s15 }
  0x1f   : > { %1676 = sst [smem:[#allocation13_spill]] %s1431_s14  ;;  %p168_p1 = scmp.eq.s32.totalorder %s939_s27, 3 }
  0x20   : > { %p1439_p2 = por %p162_p13, %p161_p12  ;;  %p941_p4 = scmp.ge.s32.totalorder %s1300_s25, 4 }
  0x21   : > { %p1443_p3 = por %p168_p1, %p167_p0 }
  0x22   : > { %184 = sbr.rel (%p941_p4) target bundleno = 82 (0x52), region = 16 }
  0x23   : > { %s1678_s6 = scalar_select %p1443_p3, 1, 0 }
  0x29   : > { %199 = sbr.rel (!%p1413_p7) target bundleno = 82 (0x52), region = 24  ;;  %s200_s26 = sand.u32 (%p1413_p7), 1, %s1280_s20  }
  0x2a   : > { %s943_s30 = sshll.u32 (%p1413_p7), %s1402_s5, 1  ;;  %s942_s7 = sshll.u32 (%p1413_p7), %s200_s26, 6 }
  0x2b   : > { %s208_s27 = ssub.s32 (%p1413_p7), 3, %s943_s30  ;;  %s1458_s12 = scalar_lea.sflag (%p1413_p7), [#allocation3], %s200_s26 }
  0x2c   : > { %p209_p5 = scmp.lt.s32.totalorder (%p1413_p7), %s208_s27, 2  ;;  %s204_s29 = scalar_lea.vmem (%p1413_p7), [#allocation2], %s942_s7 }
  0x30   : > { %s1702_s27 = smov (!%p209_p5, %s208_s27), 2 }
  0x31   : > { %s1455_s9 = sshll.u32 %s1702_s27, 9 }
  0x32   : > { %s213_s10 = ssub.s32 1024, %s1455_s9 }
  0x33   : > { %214 = vsyncadd %s1458_s12, %s213_s10  ;;  %p945_p6 = scmp.ne.s32.totalorder %s1455_s9, 0  ;;  %s1047_s5 = smul.u32 12, %s1296_s24 }
  0x34   : > { %s947_s8 = sshll.u32 %s1702_s27, 3  ;;  %s222_s28 = sshll.u32 %s204_s29, 4  ;;  %s1464_s28 = int_to_ptr.vmem [resolvable:$true] %s222_s28 }
  0x35   : > { %s217_s23 = sadd.s32 %s1047_s5, %s943_s30  ;;  %s1679_s1 = sld [smem:[#allocation14_spill]] }
  0x36   : > { %s946_s13 = sshll.u32 %s217_s23, 7 }
  0x3b   : > { %s1469_s26 = scalar_lea.hbm %s1679_s1, %s946_s13  ;;  %s1154_s30 = scalar_lea.hbm %s1679_s1, 3072 }
  0x3c   : > { %s1150_s7 = scalar_lea.hbm %s1469_s26, %s1455_s9  ;;  %p1155_p10 = scmp.lt.u32.totalorder %s1469_s26, %s1679_s1 }
  0x3d   : > { %p1151_p7 = scmp.ne.s32.totalorder %s1469_s26, %s1150_s7  ;;  %p1156_p12 = scmp.lt.u32.totalorder %s1154_s30, %s1150_s7 }
  0x3e   : > { %p1158_p0 = scmp.lt.u32.totalorder %s1150_s7, %s1469_s26 }
  0x3f   : > { %p1152_p8 = pnand %p1151_p7, %p945_p6  ;;  %p1157_p13 = por %p1156_p12, %p1155_p10 }
  0x41   : > { %p1153_p9 = pneg %p1152_p8  ;;  %p1159_p1 = por %p1158_p0, %p1157_p13 }
  0x43   : > { %p1160_p4 = pnand %p1159_p1, %p1153_p9 }
  0x45   : > { %1163 = shalt.err (!%p1160_p4)
}
  0x46   : > { %s1164_s20 = scalar_lea.vmem %s1464_s28, %s1455_s9  ;;  %s1302_s13 = smov [#allocation2]  }
  0x47   : > { %p1165_p5 = scmp.ne.s32.totalorder %s1464_s28, %s1164_s20  ;;  %s1168_s14 = sshll.u32 %s1302_s13, 4  ;;  %s1169_s14 = int_to_ptr.vmem [resolvable:$false] %s1168_s14 }
  0x48   : > { %s1170_s10 = scalar_lea.vmem %s1169_s14, 2048  ;;  %p1171_p3 = scmp.lt.s32.totalorder %s1464_s28, %s1169_s14 }
  0x49   : > { %p1166_p7 = pnand %p1165_p5, %p945_p6  ;;  %p1172_p10 = scmp.lt.s32.totalorder %s1170_s10, %s1164_s20 }
  0x4b   : > { %p1167_p8 = pneg %p1166_p7  ;;  %p1173_p12 = por %p1172_p10, %p1171_p3 }
  0x4d   : > { %p1174_p13 = pnand %p1173_p12, %p1167_p8 }
  0x4f   : > { %1177 = shalt.err (!%p1174_p13)
}
  0x50   : > { %s1303_s7 = smov 384   ;;  %s1304_s29 = smov 256  }
  0x51   : > { %228 = dma.hbm_to_vmem [thread:$0]  (%p945_p6), %s1469_s26, %s1455_s9, %s1464_s28, %s1458_s12, %s1303_s7, %s1304_s29, %s947_s8  }
  0x52 PF: > { %p950_p9 = scmp.ge.s32.totalorder %s1300_s25, 1  ;;  %p246_p0 = scmp.lt.s32.totalorder %s1300_s25, 5 }
  0x54   : > { %p247_p3 = pnand %p950_p9, %p246_p0 }
  0x55   : > { %s252_s30 = sand.u32 (!%p247_p3), 1, %s1276_s19  }
  0x56   : > { %250 = sbr.rel (%p247_p3) target bundleno = 366 (0x16e), region = 36  ;;  %s951_s5 = sshll.u32 (!%p247_p3), %s252_s30, 6 }
  0x57   : > { %s253_s23 = scalar_lea.sflag (!%p247_p3), [#allocation3], %s252_s30  ;;  %s1501_s20 = scalar_lea.vmem (!%p247_p3), [#allocation2], %s951_s5 }
  0x5d   : > { %1251 = dma.done.wait (%p1420_p11), %s253_s23, 1024  }
  0x5e   : > { %1253 = vsyncadd (%p1420_p11), %s253_s23, 4294966272  ;;  %s1667_s28 = sand.u32 1, %s1264_s16   ;;  %s953_s27 = sshll.u32 %s1284_s21, 1 }
  0x5f   : > { %s952_s9 = sshll.u32 %s1667_s28, 5  ;;  %p300_p6 = scmp.lt.s32.totalorder %s1288_s22, 1 }
  0x60   : > { %p302_p1 = scmp.lt.s32.totalorder %s953_s27, 3  ;;  %s1526_s1 = scalar_lea.vmem [#allocation5], %s952_s9 }
  0x61   : > { %s301_s12 = scalar_select %p300_p6, %s1288_s22, 1 }
  0x62   : > { %s1704_s27 = smov (!%p302_p1, %s953_s27), 3  ;;  %p959_p11 = scmp.ne.s32.totalorder %s1284_s21, 0 }
  0x63   : > { %s954_s8 = sshll.u32 %s301_s12, 2  ;;  %s992_s26 = sshll.u32 %s301_s12, 5  ;;  %v1305_v0 = vmov (!%p959_p11), 0.0  }
  0x64   : > { %s305_s13 = sadd.s32 %s954_s8, %s1704_s27  ;;  %s1516_s11 = scalar_lea.vmem %s1660_s2, %s992_s26  ;;  %329 = vst [vmem:[%s1526_s1] sm:$0xff] (!%p959_p11), %v1305_v0  ;;  %330 = vst [vmem:[%s1526_s1 + $0x8] sm:$0xff] (!%p959_p11), %v1305_v0 }
  0x65   : > { %s306_s30 = scalar_lea.vmem %s1658_s0, %s305_s13  ;;  %s1524_s28 = scalar_lea.vmem %s1661_s3, %s992_s26  ;;  %331 = vst [vmem:[%s1526_s1 + $0x10] sm:$0xff] (!%p959_p11), %v1305_v0  ;;  %332 = vst [vmem:[%s1526_s1 + $0x18] sm:$0xff] (!%p959_p11), %v1305_v0 }
  0x66   : > { %328 = sbr.rel (%p959_p11) target bundleno = 109 (0x6d), region = 44 }
  0x6d PF: > { %v346_v1 = vlaneseq  ;;  %v333_v2 = vld [vmem:[%s1516_s11] sm:$0xff]  ;;  %vm367_vm0 = vcmask 64512   ;;  %v334_v7 = vld [vmem:[%s1516_s11 + $0x8] sm:$0xff]  ;;  %v1306_v8 = vmov 1.0   ;;  %v335_v10 = vld [vmem:[%s1516_s11 + $0x10] sm:$0xff]  ;;  %s1307_s14 = smov [#allocation5]  }
  0x6e   : > { %v961_v3 = vld [vmem:[%s306_s30] ss:$0 sm:$0xff]  ;;  %1017 = vmatprep.mubr.msk.f32.mxu0 %vm367_vm0, %v333_v2  ;;  %v973_v4 = vld [vmem:[%s306_s30 + $0x1] ss:$0 sm:$0xff]  ;;  %v338_v9 = vld [vmem:[%s1524_s28 + $0x8] sm:$0xff]  ;;  %s1182_s10 = sshll.u32 %s1307_s14, 4  ;;  %s1183_s10 = int_to_ptr.vmem [resolvable:$false] %s1182_s10 }
  0x6f   : > { %v337_v5 = vld [vmem:[%s1524_s28] sm:$0xff]  ;;  %v359_v6 = vshrl.u32 %v346_v1, 7  ;;  %v339_v11 = vld [vmem:[%s1524_s28 + $0x10] sm:$0xff]  ;;  %v336_v12 = vld [vmem:[%s1516_s11 + $0x18] sm:$0xff]  ;;  %v347_v14 = vand.u32 127, %v346_v1  ;;  %s1184_s11 = scalar_lea.vmem %s1183_s10, 1024 }
  0x70   : > { %1025 = vmatprep.mubr.msk.f32.mxu1 %vm367_vm0, %v337_v5  ;;  %v340_v13 = vld [vmem:[%s1524_s28 + $0x18] sm:$0xff]  ;;  %s960_s28 = sshll.u32 %s1284_s21, 8  ;;  %v343_v17 = vld [vmem:[%s1501_s20 + $0x10] sm:$0xff]  ;;  %v342_v18 = vld [vmem:[%s1501_s20] sm:$0xff]  ;;  %s994_s21 = sshll.u32 %s1288_s22, 9 }
  0x71   : > { %vm364_vm1 = vcmp.eq.s32.totalorder %v359_v6, %v961_v3  ;;  %vm597_vm2 = vcmp.eq.s32.totalorder %v359_v6, %v973_v4  ;;  %v348_v15 = vstv %s960_s28  ;;  %s582_s27 = sadd.s32 128, %s960_s28  ;;  %v345_v22 = vld [vmem:[%s1501_s20 + $0x30] sm:$0xff]  ;;  %v344_v25 = vld [vmem:[%s1501_s20 + $0x20] sm:$0xff]  ;;  %v579_v34 = vld [vmem:[%s1501_s20 + $0x18] sm:$0xff]  ;;  %s1589_s8 = scalar_lea.hbm %s1662_s4, %s994_s21 }
  0x72   : > { %1015 = vmatprep.subr.msk.mxu0 %vm364_vm1, %v1306_v8  ;;  %1023 = vmatprep.subr.msk.mxu1 %vm364_vm1, %v1306_v8  ;;  %v349_v16 = vadd.s32 %v348_v15, %v347_v14  ;;  %v583_v19 = vstv %s582_s27  ;;  %v578_v37 = vld [vmem:[%s1501_s20 + $0x8] sm:$0xff]  ;;  %v581_v48 = vld [vmem:[%s1501_s20 + $0x38] sm:$0xff]  ;;  %s1680_s22 = sand.u32 1, %s1264_s16  }
  0x73   : > { %1016 = vmatpush3.msk.msra.mxu0 %vm364_vm1, %v1306_v8  ;;  %1024 = vmatpush3.msk.msra.mxu1 %vm364_vm1, %v1306_v8  ;;  %v584_v23 = vadd.s32 %v583_v19, %v347_v14  ;;  %v580_v51 = vld [vmem:[%s1501_s20 + $0x28] sm:$0xff]  ;;  %s812_s20 = sshll.u32 %s1526_s1, 4  ;;  %v788_v19 = vld [vmem:[%s1526_s1 + $0x10] sm:$0xff]  ;;  %s1597_s26 = scalar_lea.sflag [#allocation4], %s1680_s22  ;;  %s1591_s20 = int_to_ptr.vmem [resolvable:$true] %s812_s20 }
  0x74   : > { %1018 = vmatmul.mubr.msk.f32.vlgmr.msra.gmra.mrb[0].mxu0 %vm367_vm0, %v334_v7  ;;  %1031 = vmatprep.subr.msk.mxu0 %vm597_vm2, %v1306_v8  ;;  %vm350_vm3 = vcmp.lt.s32.totalorder %v349_v16, 320  ;;  %v787_v4 = vld [vmem:[%s1526_s1 + $0x8] sm:$0xff]  ;;  %v789_v16 = vld [vmem:[%s1526_s1 + $0x18] sm:$0xff]  ;;  %s1178_s13 = scalar_lea.vmem %s1591_s20, 512  ;;  %p1185_p8 = scmp.lt.s32.totalorder %s1591_s20, %s1183_s10 }
  0x75   : > { %1032 = vmatpush3.msk.msra.mxu0 %vm597_vm2, %v1306_v8  ;;  %1026 = vmatmul.mubr.msk.f32.vlgmr.msra.gmra.mrb[0].mxu1 %vm367_vm0, %v338_v9  ;;  %v354_v20 = vsel %vm350_vm3, %v343_v17, 0.0  ;;  %v353_v21 = vsel %vm350_vm3, %v342_v18, 0.0  ;;  %v356_v31 = vsel %vm350_vm3, %v345_v22, 0.0  ;;  %v355_v33 = vsel %vm350_vm3, %v344_v25, 0.0  ;;  %p1179_p4 = scmp.ne.s32.totalorder %s1591_s20, %s1178_s13  ;;  %p1186_p10 = scmp.lt.s32.totalorder %s1184_s11, %s1178_s13 }
  0x76   : > { %1039 = vmatprep.subr.msk.mxu1 %vm597_vm2, %v1306_v8  ;;  %1020 = vmatprep.mubr.msk.f32.mxu0 %vm367_vm0, %v335_v10  ;;  %vm585_vm4 = vcmp.lt.s32.totalorder %v584_v23, 320 }
  0x77   : > { %1040 = vmatpush3.msk.msra.mxu1 %vm597_vm2, %v1306_v8  ;;  %1028 = vmatprep.mubr.msk.f32.mxu1 %vm367_vm0, %v339_v11  ;;  %v589_v45 = vsel %vm585_vm4, %v579_v34, 0.0  ;;  %v588_v47 = vsel %vm585_vm4, %v578_v37, 0.0  ;;  %v591_v59 = vsel %vm585_vm4, %v581_v48, 0.0  ;;  %v590_v61 = vsel %vm585_vm4, %v580_v51, 0.0  ;;  %p1180_p5 = pnand %p1179_p4, %p1439_p2  ;;  %p1187_p12 = por %p1186_p10, %p1185_p8 }
  0x78   : > { %1021 = vmatmul.mubr.msk.f32.gmra.mrb[2].mxu0 %vm367_vm0, %v336_v12 }
  0x79   : > { %1029 = vmatmul.mubr.msk.f32.gmra.mrb[2].mxu1 %vm367_vm0, %v340_v13  ;;  %1033 = vmatprep.mubr.msk.f32.mxu0 %vm367_vm0, %v333_v2  ;;  %p1181_p7 = pneg %p1180_p5 }
  0x7a   : > { %1041 = vmatprep.mubr.msk.f32.mxu1 %vm367_vm0, %v337_v5 }
  0x7b   : > { %p1188_p13 = pnand %p1187_p12, %p1181_p7 }
  0x7c   : > { %1034 = vmatmul.mubr.msk.f32.vlgmr.msra.gmra.mrb[4].mxu0 %vm367_vm0, %v334_v7 }
  0x7d   : > { %1042 = vmatmul.mubr.msk.f32.vlgmr.msra.gmra.mrb[4].mxu1 %vm367_vm0, %v338_v9  ;;  %1036 = vmatprep.mubr.msk.f32.mxu0 %vm367_vm0, %v335_v10  ;;  %v786_v9 = vld [vmem:[%s1526_s1] sm:$0xff] }
  0x7e   : > { %1044 = vmatprep.mubr.msk.f32.mxu1 %vm367_vm0, %v339_v11 }
  0x80   : > { %1037 = vmatmul.mubr.msk.f32.gmra.mrb[6].mxu0 %vm367_vm0, %v336_v12 }
  0x81   : > { %1045 = vmatmul.mubr.msk.f32.gmra.mrb[6].mxu1 %vm367_vm0, %v340_v13 }
 0x147   : > { %v1019_v24 = vpop.f32.mrb[0].mxu0 }
 0x148   : > { %v563_v26 = vmul.f32 %v1019_v24, %v354_v20  ;;  %v446_v27 = vpop.f32.mrb[1].mxu0  ;;  %v1027_v28 = vpop.f32.mrb[0].mxu1 }
 0x149   : > { %v562_v29 = vmul.f32 %v446_v27, %v353_v21  ;;  %v543_v30 = vpop.f32.mrb[1].mxu1 }
 0x14a   : > { %v567_v32 = vsub.f32 %v563_v26, %v1027_v28 }
 0x14b   : > { %v566_v35 = vsub.f32 %v562_v29, %v543_v30  ;;  %v1022_v36 = vpop.f32.mrb[2].mxu0 }
 0x14c   : > { %v571_v38 = vmul.f32 %v567_v32, %v354_v20  ;;  %v565_v39 = vmul.f32 %v1022_v36, %v356_v31  ;;  %v456_v40 = vpop.f32.mrb[3].mxu0  ;;  %v1030_v41 = vpop.f32.mrb[2].mxu1 }
 0x14d   : > { %v570_v42 = vmul.f32 %v566_v35, %v353_v21  ;;  %v564_v43 = vmul.f32 %v456_v40, %v355_v33  ;;  %v553_v44 = vpop.f32.mrb[3].mxu1 }
 0x14e   : > { %v569_v46 = vsub.f32 %v565_v39, %v1030_v41 }
 0x14f   : > { %v568_v49 = vsub.f32 %v564_v43, %v553_v44  ;;  %v1035_v50 = vpop.f32.mrb[4].mxu0 }
 0x150   : > { %v573_v52 = vmul.f32 %v569_v46, %v356_v31  ;;  %v771_v53 = vmul.f32 %v1035_v50, %v589_v45  ;;  %v666_v54 = vpop.f32.mrb[5].mxu0  ;;  %v1043_v55 = vpop.f32.mrb[4].mxu1 }
 0x151   : > { %v572_v56 = vmul.f32 %v568_v49, %v355_v33  ;;  %v770_v57 = vmul.f32 %v666_v54, %v588_v47  ;;  %v751_v58 = vpop.f32.mrb[5].mxu1 }
 0x152   : > { %v775_v60 = vsub.f32 %v771_v53, %v1043_v55 }
 0x153   : > { %v774_v62 = vsub.f32 %v770_v57, %v751_v58  ;;  %v1038_v63 = vpop.f32.mrb[6].mxu0 }
 0x154   : > { %v779_v0 = vmul.f32 %v775_v60, %v589_v45  ;;  %v773_v1 = vmul.f32 %v1038_v63, %v591_v59  ;;  %v676_v2 = vpop.f32.mrb[7].mxu0  ;;  %v1046_v3 = vpop.f32.mrb[6].mxu1 }
 0x155   : > { %v778_v5 = vmul.f32 %v774_v62, %v588_v47  ;;  %v772_v6 = vmul.f32 %v676_v2, %v590_v61  ;;  %v761_v7 = vpop.f32.mrb[7].mxu1 }
 0x156   : > { %v783_v8 = vadd.f32 %v779_v0, %v571_v38  ;;  %v777_v10 = vsub.f32 %v773_v1, %v1046_v3 }
 0x157   : > { %v782_v11 = vadd.f32 %v778_v5, %v570_v42  ;;  %v776_v12 = vsub.f32 %v772_v6, %v761_v7 }
 0x158   : > { %v791_v13 = vadd.f32 %v787_v4, %v783_v8  ;;  %v781_v14 = vmul.f32 %v777_v10, %v591_v59 }
 0x159   : > { %v790_v15 = vadd.f32 %v786_v9, %v782_v11  ;;  %v780_v17 = vmul.f32 %v776_v12, %v590_v61 }
 0x15a   : > { %795 = vst [vmem:[%s1526_s1 + $0x8] sm:$0xff] %v791_v13  ;;  %v785_v18 = vadd.f32 %v781_v14, %v573_v52 }
 0x15b   : > { %794 = vst [vmem:[%s1526_s1] sm:$0xff] %v790_v15  ;;  %v784_v20 = vadd.f32 %v780_v17, %v572_v56 }
 0x15c   : > { %v793_v21 = vadd.f32 %v789_v16, %v785_v18 }
 0x15d   : > { %v792_v22 = vadd.f32 %v788_v19, %v784_v20 }
 0x15e   : > { %797 = vst [vmem:[%s1526_s1 + $0x18] sm:$0xff] %v793_v21 }
 0x15f   : > { %796 = vst [vmem:[%s1526_s1 + $0x10] sm:$0xff] %v792_v22 }
 0x160   : > { %1191 = shalt.err (!%p1188_p13)
}
 0x161   : > { %s1192_s1 = scalar_lea.hbm %s1589_s8, 512  ;;  %s1196_s30 = scalar_lea.hbm %s1662_s4, 1024 }
 0x162   : > { %p1193_p9 = scmp.ne.s32.totalorder %s1589_s8, %s1192_s1  ;;  %p1197_p6 = scmp.lt.u32.totalorder %s1589_s8, %s1662_s4 }
 0x163   : > { %p1198_p1 = scmp.lt.u32.totalorder %s1196_s30, %s1192_s1  ;;  %p1200_p4 = scmp.lt.u32.totalorder %s1192_s1, %s1589_s8 }
 0x164   : > { %p1194_p0 = pnand %p1193_p9, %p1439_p2 }
 0x165   : > { %p1199_p11 = por %p1198_p1, %p1197_p6 }
 0x166   : > { %p1195_p3 = pneg %p1194_p0 }
 0x167   : > { %p1201_p5 = por %p1200_p4, %p1199_p11 }
 0x169   : > { %p1202_p7 = pnand %p1201_p5, %p1195_p3 }
 0x16b   : > { %1205 = shalt.err (!%p1202_p7)
}
 0x16c   : > { %s1308_s28 = smov 128   ;;  %s1309_s27 = smov 8  }
 0x16d   : > { %1049 = dma.vmem_to_hbm [thread:$0]  (%p1439_p2), %s1591_s20, 512, %s1589_s8, %s1597_s26, %s1308_s28, %s1308_s28, %s1309_s27  }
 0x16e PF: > { %p1055_p8 = scmp.ge.s32.totalorder %s1300_s25, 2  ;;  %s827_s21 = sand.u32 1, %s1260_s15  }
 0x16f   : > { %p1681_p10 = scmp.ne.s32.totalorder %s1678_s6, 0  ;;  %s828_s9 = scalar_lea.sflag [#allocation4], %s827_s21 }
 0x171   : > { %p1052_p12 = pnand %p1055_p8, %p1681_p10 }
 0x173   : > { %1255 = dma.done.wait (!%p1052_p12), %s828_s9, 512  }
 0x174   : > { %1257 = vsyncadd (!%p1052_p12), %s828_s9, 4294966784  ;;  %s20_s25 = sadd.s32 1, %s1300_s25   ;;  %s1682_s12 = sld [smem:[#allocation13_spill]] }
 0x175   : > { %p17_p13 = scmp.ge.s32.totalorder %s20_s25, 6   ;;  %s1683_s22 = sld [smem:[#allocation8_spill]] }
 0x176   : > { %s1684_s20 = sld [smem:[#allocation12_spill]]  ;;  %s1685_s21 = sld [smem:[#allocation9_spill]] }
 0x177   : > { %s1686_s23 = sld [smem:[#allocation10_spill]]  ;;  %s1687_s8 = sld [smem:[#allocation11_spill]] }
 0x178   : > { %s1688_s15 = smov %s1264_s16  ;;  %s1689_s16 = smov %s1268_s17 }
 0x179   : > { %s1691_s18 = smov %s1276_s19  ;;  %19 = sbr.rel (!%p17_p13) target bundleno = 11 (0xb), region = 94 }
 0x17a   : > { %s1690_s17 = smov %s1682_s12 }
 0x17b   : > { %s1692_s19 = smov %s1683_s22  ;;  %s1693_s22 = smov %s1296_s24 }
 0x17d   : > { %s1694_s24 = smov %s1687_s8 }
 0x180   :  { %833 = vsyncpa [#allocation3], 1 }
 0x181   :  { %835 = vsyncpa [#allocation3 + $0x1], 1 }
 0x182   :  { %836 = vsyncpa [#allocation4], 1 }
 0x183   :  { %838 = vsyncpa [#allocation4 + $0x1], 1 }

</bundles_post_ra>
